<compile_context>
chip_gen: v7x
topology: tpu7x:2x2x1
jax: 0.10.0
libtpu: 0.0.40
codegen_flags: <defaults>
</compile_context>

<pallas_src>
import functools

import jax
import jax.numpy as jnp
from jax.experimental import pallas as pl
from jax.experimental.pallas import tpu as pltpu


def _separable_conv1d_kernel(x_ref, wdw_ref, bdw_ref, wpw_ref, bpw_ref, o_ref,
                             *, kernel_size: int, padding: int, l_out: int):
    # x_ref:   (R_in,  L)      R_in  = Bc*C_in  (batch folded into sublanes)
    # wdw_ref: (R_in,  K)      depthwise weight, replicated per batch-in-chunk
    # bdw_ref: (R_in,  1)      depthwise bias, replicated per batch-in-chunk
    # wpw_ref: (R_out, R_in)   block-diagonal pointwise weight, R_out = Bc*C_out
    # bpw_ref: (R_out, 1)      pointwise bias, replicated per batch-in-chunk
    # o_ref:   (R_out, L_out)  natural (batch, C_out) row-major output slab
    r_in = x_ref.shape[0]

    # Cast the whole input slab once (hoisted) and build the padded slab in
    # vregs -- no VMEM scratch, no masked partial stores, no false dep between
    # the depthwise and pointwise stages.
    x = x_ref[...].astype(jnp.float32)
    if padding > 0:
        zeros = jnp.zeros((r_in, padding), jnp.float32)
        xp = jnp.concatenate([zeros, x, zeros], axis=1)       # (R_in, L + 2*pad)
    else:
        xp = x

    # Hoist every per-tap weight broadcast (and the bias broadcast) out of the
    # tap loop: K broadcasts total instead of being re-emitted inside the loop.
    wdw = wdw_ref[...].astype(jnp.float32)                    # (R_in, K)
    wdw_taps = [jnp.broadcast_to(wdw[:, k:k + 1], (r_in, l_out))
                for k in range(kernel_size)]
    acc = jnp.broadcast_to(bdw_ref[...].astype(jnp.float32), (r_in, l_out))

    # Depthwise (groups == C_in): K shifted FMAs over all batches at once,
    # fully register-resident.
    # TODO(synk): on 128-aligned production tiles use pltpu.roll(xp, -k) so the
    # shift issues on the idle XLU instead of lane-slice select work.
    for k in range(kernel_size):                              # K tiny, static
        acc = acc + wdw_taps[k] * xp[:, k:k + l_out]

    # Pointwise 1x1 conv: one block-diagonal matmul on the (otherwise idle)
    # MXU.  bf16 models feed the MXU in bf16 (f32 accumulation).
    if o_ref.dtype == jnp.bfloat16:
        y = jnp.dot(wpw_ref[...].astype(jnp.bfloat16), acc.astype(jnp.bfloat16),
                    preferred_element_type=jnp.float32)
    else:
        y = jnp.dot(wpw_ref[...].astype(jnp.float32), acc,
                    preferred_element_type=jnp.float32)
    y = y + bpw_ref[...].astype(jnp.float32)                  # (R_out, 1) bcast
    o_ref[...] = y.astype(o_ref.dtype)                        # one full store


def separable_conv1d(x, w_dw, b_dw, w_pw, b_pw, *, kernel_size=1, padding=0):
    """x: (B, C_in, L) -> (B, C_out, L + 2*padding - kernel_size + 1).

    Matches the PyTorch module's nn.Conv1d defaults: stride=1, dilation=1.
    """
    B, C_in, L = x.shape
    C_out = w_pw.shape[0]
    L_out = L + 2 * padding - kernel_size + 1
    assert L_out > 0
    assert w_dw.shape == (C_in, kernel_size)

    # Batch-chunk "parallel" grid axis (v7x has 2 TensorCores) only when every
    # chunk keeps both sublane dims 8-aligned (the (8,128) block rule).  At the
    # tiny test config this collapses to a single fused step, which also keeps
    # the depthwise vreg sublanes full (Bc*C_in = 8).
    if B % 2 == 0 and ((B // 2) * C_in) % 8 == 0 and ((B // 2) * C_out) % 8 == 0:
        chunks = 2
    else:
        chunks = 1
    Bc = B // chunks

    # Tiny, constant-shaped weight "layout plumbing" (not input pre-scaling):
    # replicate the depthwise params per batch-in-chunk and build a block-
    # diagonal pointwise weight so a single MXU matmul mixes channels for every
    # batch in the chunk and emits the natural (B*C_out, L_out) layout.
    wdw_t = jnp.tile(w_dw, (Bc, 1))                              # (Bc*C_in, K)
    bdw_t = jnp.tile(b_dw, (Bc, 1))                              # (Bc*C_in, 1)
    wpw_bd = jnp.kron(jnp.eye(Bc, dtype=w_pw.dtype), w_pw)       # (Bc*C_out, Bc*C_in)
    bpw_t = jnp.tile(b_pw, (Bc, 1))                              # (Bc*C_out, 1)

    x2 = x.reshape(B * C_in, L)                                  # free reshape

    kernel = functools.partial(_separable_conv1d_kernel,
                               kernel_size=kernel_size, padding=padding,
                               l_out=L_out)

    out = pl.pallas_call(
        kernel,
        out_shape=jax.ShapeDtypeStruct((B * C_out, L_out), x.dtype),
        grid_spec=pltpu.PrefetchScalarGridSpec(
            num_scalar_prefetch=0,
            grid=(chunks,),
            in_specs=[
                pl.BlockSpec((Bc * C_in, L), lambda i: (i, 0)),            # x
                pl.BlockSpec((Bc * C_in, kernel_size), lambda i: (0, 0)),  # w_dw
                pl.BlockSpec((Bc * C_in, 1), lambda i: (0, 0)),            # b_dw
                pl.BlockSpec((Bc * C_out, Bc * C_in), lambda i: (0, 0)),   # w_pw
                pl.BlockSpec((Bc * C_out, 1), lambda i: (0, 0)),           # b_pw
            ],
            out_specs=pl.BlockSpec((Bc * C_out, L_out), lambda i: (i, 0)),
        ),
        # No VMEM scratch; the working set is a few KiB of vregs, so no
        # vmem_limit_bytes re-budgeting is needed even on v7x (64 MiB).
        compiler_params=pltpu.CompilerParams(
            dimension_semantics=("parallel",)),
    )(x2, wdw_t, bdw_t, wpw_bd, bpw_t)

    return out.reshape(B, C_out, L_out)                          # free reshape


def _reference(x, w_dw, b_dw, w_pw, b_pw, *, kernel_size, padding):
    # plain-JAX reference of the PyTorch forward
    B, C_in, L = x.shape
    L_out = L + 2 * padding - kernel_size + 1
    xp = jnp.pad(x, ((0, 0), (0, 0), (padding, padding)))
    dw = sum(w_dw[None, :, k:k + 1] * xp[:, :, k:k + L_out]
             for k in range(kernel_size)) + b_dw[None, :, :]
    y = jnp.einsum('oc,bcl->bol', w_pw, dw,
                   precision=jax.lax.Precision.HIGHEST) + b_pw[None, :, :]
    return y


if __name__ == "__main__":
    # module config: in_channel=4, out_channel=8, kernel_size=3, padding=1
    B, C_in, C_out, L = 2, 4, 8, 16
    K, PAD = 3, 1

    key = jax.random.PRNGKey(0)
    kx, k1, k2, k3, k4 = jax.random.split(key, 5)
    x = jax.random.normal(kx, (B, C_in, L), dtype=jnp.float32)
    # deterministic synthetic parameters (shapes match nn.Conv1d weights)
    w_dw = jax.random.normal(k1, (C_in, K), dtype=jnp.float32) * 0.5   # (C_in,1,K) squeezed
    b_dw = jax.random.normal(k2, (C_in, 1), dtype=jnp.float32) * 0.1
    w_pw = jax.random.normal(k3, (C_out, C_in), dtype=jnp.float32) * 0.5
    b_pw = jax.random.normal(k4, (C_out, 1), dtype=jnp.float32) * 0.1

    out = separable_conv1d(x, w_dw, b_dw, w_pw, b_pw,
                           kernel_size=K, padding=PAD)
    out = jax.block_until_ready(out)

    ref = _reference(x, w_dw, b_dw, w_pw, b_pw, kernel_size=K, padding=PAD)
    assert out.shape == (B, C_out, L + 2 * PAD - K + 1)
    # tolerance allows for MXU multi-pass f32 accumulation in the pointwise mix
    assert jnp.allclose(out, ref, atol=1e-4, rtol=1e-4), "mismatch vs reference"
    print("KERNEL_OK")
</pallas_src>

<mosaic_0001>
module attributes {stable_mosaic.version = 11 : i64} {
  func.func @_separable_conv1d_kernel(%arg0: i32, %arg1: memref<8x16xf32, #tpu.memory_space<vmem>>, %arg2: memref<8x3xf32, #tpu.memory_space<vmem>>, %arg3: memref<8x1xf32, #tpu.memory_space<vmem>>, %arg4: memref<16x8xf32, #tpu.memory_space<vmem>>, %arg5: memref<16x1xf32, #tpu.memory_space<vmem>>, %arg6: memref<16x16xf32, #tpu.memory_space<vmem>>) attributes {dimension_semantics = [#tpu.dimension_semantics<parallel>], iteration_bounds = array<i64: 1>, scalar_prefetch = 0 : i64, scratch_operands = 0 : i64, tpu.core_type = #tpu.core_type<tc>, window_params = [{transform_indices = @transform_0, window_bounds = array<i64: 8, 16>}, {pipeline_mode = #tpu.pipeline_mode<synchronous>, transform_indices = @transform_1, window_bounds = array<i64: 8, 3>}, {pipeline_mode = #tpu.pipeline_mode<synchronous>, transform_indices = @transform_2, window_bounds = array<i64: 8, 1>}, {pipeline_mode = #tpu.pipeline_mode<synchronous>, transform_indices = @transform_3, window_bounds = array<i64: 16, 8>}, {pipeline_mode = #tpu.pipeline_mode<synchronous>, transform_indices = @transform_4, window_bounds = array<i64: 16, 1>}, {transform_indices = @transform_5, window_bounds = array<i64: 16, 16>}]} {
    %c0 = arith.constant 0 : index
    %c0_0 = arith.constant 0 : index
    %0 = vector.load %arg1[%c0, %c0_0] : memref<8x16xf32, #tpu.memory_space<vmem>>, vector<8x16xf32>
    %cst = arith.constant 0.000000e+00 : f32
    %1 = vector.broadcast %cst : f32 to vector<8x1xf32>
    %2 = tpu.concatenate %1, %0, %1 in 1 : vector<8x1xf32>, vector<8x16xf32>, vector<8x1xf32> -> vector<8x18xf32>
    %c0_1 = arith.constant 0 : index
    %c0_2 = arith.constant 0 : index
    %3 = vector.load %arg2[%c0_1, %c0_2] : memref<8x3xf32, #tpu.memory_space<vmem>>, vector<8x3xf32>
    %4 = vector.extract_strided_slice %3 {offsets = [0, 0], sizes = [8, 1], strides = [1, 1]} : vector<8x3xf32> to vector<8x1xf32>
    %5 = vector.shape_cast %4 : vector<8x1xf32> to vector<8x1xf32>
    %6 = vector.broadcast %5 : vector<8x1xf32> to vector<8x16xf32>
    %7 = vector.extract_strided_slice %3 {offsets = [0, 1], sizes = [8, 1], strides = [1, 1]} : vector<8x3xf32> to vector<8x1xf32>
    %8 = vector.shape_cast %7 : vector<8x1xf32> to vector<8x1xf32>
    %9 = vector.broadcast %8 : vector<8x1xf32> to vector<8x16xf32>
    %10 = vector.extract_strided_slice %3 {offsets = [0, 2], sizes = [8, 1], strides = [1, 1]} : vector<8x3xf32> to vector<8x1xf32>
    %11 = vector.shape_cast %10 : vector<8x1xf32> to vector<8x1xf32>
    %12 = vector.broadcast %11 : vector<8x1xf32> to vector<8x16xf32>
    %c0_3 = arith.constant 0 : index
    %c0_4 = arith.constant 0 : index
    %13 = vector.load %arg3[%c0_3, %c0_4] : memref<8x1xf32, #tpu.memory_space<vmem>>, vector<8x1xf32>
    %14 = vector.shape_cast %13 : vector<8x1xf32> to vector<8x1xf32>
    %15 = vector.broadcast %14 : vector<8x1xf32> to vector<8x16xf32>
    %16 = vector.extract_strided_slice %2 {offsets = [0, 0], sizes = [8, 16], strides = [1, 1]} : vector<8x18xf32> to vector<8x16xf32>
    %17 = arith.mulf %6, %16 : vector<8x16xf32>
    %18 = arith.addf %15, %17 : vector<8x16xf32>
    %19 = vector.extract_strided_slice %2 {offsets = [0, 1], sizes = [8, 16], strides = [1, 1]} : vector<8x18xf32> to vector<8x16xf32>
    %20 = arith.mulf %9, %19 : vector<8x16xf32>
    %21 = arith.addf %18, %20 : vector<8x16xf32>
    %22 = vector.extract_strided_slice %2 {offsets = [0, 2], sizes = [8, 16], strides = [1, 1]} : vector<8x18xf32> to vector<8x16xf32>
    %23 = arith.mulf %12, %22 : vector<8x16xf32>
    %24 = arith.addf %21, %23 : vector<8x16xf32>
    %c0_5 = arith.constant 0 : index
    %c0_6 = arith.constant 0 : index
    %25 = vector.load %arg4[%c0_5, %c0_6] : memref<16x8xf32, #tpu.memory_space<vmem>>, vector<16x8xf32>
    %cst_7 = arith.constant dense<0.000000e+00> : vector<16x16xf32>
    %26 = tpu.matmul %25, %24, %cst_7 {dimension_numbers = #tpu.dot_dimension_numbers<[1], [0], [0], [1], [0, 0, 1, 1], [], []>} : vector<16x8xf32>, vector<8x16xf32>, vector<16x16xf32> -> vector<16x16xf32>
    %c0_8 = arith.constant 0 : index
    %c0_9 = arith.constant 0 : index
    %27 = vector.load %arg5[%c0_8, %c0_9] : memref<16x1xf32, #tpu.memory_space<vmem>>, vector<16x1xf32>
    %28 = vector.broadcast %27 : vector<16x1xf32> to vector<16x16xf32>
    %29 = arith.addf %26, %28 : vector<16x16xf32>
    %c0_10 = arith.constant 0 : index
    %c0_11 = arith.constant 0 : index
    %30 = vector.load %arg6[%c0_10, %c0_11] : memref<16x16xf32, #tpu.memory_space<vmem>>, vector<16x16xf32>
    tpu.vector_store %arg6[%c0_10, %c0_11], %29 {strides = array<i32>} : memref<16x16xf32, #tpu.memory_space<vmem>>, vector<16x16xf32>,
    return
  }
  func.func @transform_0(%arg0: i32) -> (i32, i32) {
    %c0_i32 = arith.constant 0 : i32
    %c0_i32_0 = arith.constant 0 : i32
    return %arg0, %c0_i32 : i32, i32
  }
  func.func @transform_1(%arg0: i32) -> (i32, i32) {
    %c0_i32 = arith.constant 0 : i32
    %c0_i32_0 = arith.constant 0 : i32
    %c0_i32_1 = arith.constant 0 : i32
    return %c0_i32, %c0_i32_0 : i32, i32
  }
  func.func @transform_2(%arg0: i32) -> (i32, i32) {
    %c0_i32 = arith.constant 0 : i32
    %c0_i32_0 = arith.constant 0 : i32
    %c0_i32_1 = arith.constant 0 : i32
    return %c0_i32, %c0_i32_0 : i32, i32
  }
  func.func @transform_3(%arg0: i32) -> (i32, i32) {
    %c0_i32 = arith.constant 0 : i32
    %c0_i32_0 = arith.constant 0 : i32
    %c0_i32_1 = arith.constant 0 : i32
    return %c0_i32, %c0_i32_0 : i32, i32
  }
  func.func @transform_4(%arg0: i32) -> (i32, i32) {
    %c0_i32 = arith.constant 0 : i32
    %c0_i32_0 = arith.constant 0 : i32
    %c0_i32_1 = arith.constant 0 : i32
    return %c0_i32, %c0_i32_0 : i32, i32
  }
  func.func @transform_5(%arg0: i32) -> (i32, i32) {
    %c0_i32 = arith.constant 0 : i32
    %c0_i32_0 = arith.constant 0 : i32
    return %arg0, %c0_i32 : i32, i32
  }
}

</mosaic_0001>

<bundles_post_ra>
// kernel: tpu_custom_call.1
= control target key start
LH: loop header
LB: loop body
LE: loop exit
PB: predicated region body
PF: predicated region fallthrough
CT: control target
= control target key end

     0   :  { %v226_v2 = vmov 1   ;;  %s227_s22 = smov 1   ;;  %s300_s0 = inlined_call_operand.vmem [shape: f32[8,16], index: 0, kind: input, shape index: {}]   ;;  %s301_s1 = inlined_call_operand.vmem [shape: f32[8,3], index: 1, kind: input, shape index: {}]   ;;  %s302_s2 = inlined_call_operand.vmem [shape: f32[8,1], index: 2, kind: input, shape index: {}]   ;;  %s303_s3 = inlined_call_operand.vmem [shape: f32[16,8], index: 3, kind: input, shape index: {}]   ;;  %s304_s4 = inlined_call_operand.vmem [shape: f32[16,1], index: 4, kind: input, shape index: {}]   ;;  %s305_s5 = inlined_call_operand.hbm [shape: f32[16,16], index: 5, kind: output, shape index: {}]  }
   0x1   :  { %v21_v0 = vld [vmem:[%s300_s0] sm:$0xff]  ;;  %198 = vset.pattern.permute.xlu0 %v226_v2 }
   0x2   :  { %v30_v1 = vld [vmem:[%s301_s1] sm:$0xff]  ;;  %23 = vrot.lane.b32.xlu1 %v21_v0, %s227_s22 }
   0x3   :  { %10 = vsyncpa [#allocation3], 0  ;;  %37 = vperm.xlu0 %198, %v30_v1   ;;  %v228_v3 = vmov 0   ;;  %v229_v4 = vmov 2   ;;  %v44_v5 = vld [vmem:[%s302_s2] sm:$0xff]  ;;  %vm26_vm0 = vcmask 7168  }
   0x4   :  { %200 = vset.pattern.permute.xlu1 %v228_v3  ;;  %vm28_vm1 = vcmask 138240   ;;  %v64_v8 = vld [vmem:[%s303_s3] sm:$0xff]  ;;  %vm78_vm2 = vcmask 64512   ;;  %s230_s25 = smov 127   ;;  %s231_s2 = smov 126   ;;  %v67_v14 = vld [vmem:[%s304_s4 + $0x8] sm:$0xff] }
   0x5   :  { %186 = vmatprep.mubr.msk.f32.mxu0 %vm78_vm2, %v64_v8  ;;  %v66_v15 = vld [vmem:[%s304_s4] sm:$0xff]  ;;  %v65_v24 = vld [vmem:[%s303_s3 + $0x8] sm:$0xff]  ;;  %s232_s7 = smov [#allocation2]   ;;  %vm160_vm3 = vcmask 130048  }
   0x6   :  { %33 = vperm.xlu1 %200, %v30_v1   ;;  %s168_s4 = sshll.u32 %s232_s7, 4  ;;  %s169_s4 = int_to_ptr.vmem [resolvable:$true] %s168_s4 }
   0x7   :  { %199 = vset.pattern.permute.xlu0 %v229_v4  ;;  %s202_s8 = scalar_lea.vmem %s169_s4, 256  ;;  %p207_p1 = scmp.lt.s32.totalorder %s169_s4, %s169_s4 }
   0x8   :  { %41 = vperm.xlu0 %199, %v30_v1   ;;  %p203_p0 = scmp.ne.s32.totalorder %s169_s4, %s202_s8  ;;  %p208_p2 = scmp.lt.s32.totalorder %s202_s8, %s202_s8 }
   0xa   :  { %47 = vperm.xlu1 %200, %v44_v5   ;;  %p209_p3 = por %p208_p2, %p207_p1 }
   0xc   :  { %201 = vset.pattern.permute.xlu0 %v228_v3  ;;  %p210_p4 = pnand %p209_p3, %p203_p0 }
  0x74   :  { %v24_v6 = vpop.permute.xlu1 %23 }
  0x75   :  { %v27_v7 = vsel %vm26_vm0, 0.0, %v24_v6 }
  0x76   :  { %v29_v9 = vsel %vm28_vm1, %v27_v7, 0.0 }
  0x82   :  { %v38_v10 = vpop.permute.xlu0 %37 }
  0x83   :  { %v52_v11 = vmul.f32 %v38_v10, %v29_v9 }
  0x85   :  { %54 = vrot.lane.b32.xlu0 %v52_v11, %s230_s25  ;;  %v34_v16 = vpop.permute.xlu1 %33 }
  0x86   :  { %v50_v18 = vmul.f32 %v34_v16, %v29_v9 }
  0x87   :  { %v42_v12 = vpop.permute.xlu0 %41 }
  0x88   :  { %v58_v13 = vmul.f32 %v42_v12, %v29_v9 }
  0x89   :  { %70 = vperm.xlu0 %201, %v66_v15   ;;  %v48_v17 = vpop.permute.xlu1 %47 }
  0x8a   :  { %60 = vrot.lane.b32.xlu1 %v58_v13, %s231_s2  ;;  %v51_v20 = vadd.f32 %v50_v18, %v48_v17 }
  0x8e   :  { %75 = vperm.xlu1 %200, %v67_v14  }
  0xf7   :  { %v55_v19 = vpop.permute.xlu0 %54 }
  0xf8   :  { %v57_v21 = vadd.f32 %v55_v19, %v51_v20 }
  0xfc   :  { %v61_v22 = vpop.permute.xlu1 %60 }
  0xfd   :  { %v63_v23 = vadd.f32 %v61_v22, %v57_v21 }
  0xff   :  { %184 = vmatprep.subr.mxu0 %v63_v23 }
 0x100   :  { %185 = vmatpush3.msra.mxu0 %v63_v23 }
 0x101   :  { %187 = vmatmul.mubr.msk.f32.vlgmr.msra.gmra.mrb[0].mxu0 %vm78_vm2, %v65_v24 }
 0x108   :  { %v71_v25 = vpop.permute.xlu0 %70 }
 0x10d   :  { %v76_v26 = vpop.permute.xlu1 %75 }
 0x1d4   :  { %v188_v27 = vpop.f32.mrb[0].mxu0 }
 0x1d5   :  { %v157_v28 = vadd.f32 %v188_v27, %v76_v26  ;;  %v151_v29 = vpop.f32.mrb[1].mxu0 }
 0x1d6   :  { %v152_v30 = vadd.f32 %v151_v29, %v71_v25 }
 0x1d7   :  { %162 = vst.msk [vmem:[#allocation2 + $0x8] sm:$0xff] %vm160_vm3, %v157_v28 }
 0x1d8   :  { %161 = vst.msk [vmem:[#allocation2] sm:$0xff] %vm160_vm3, %v152_v30 }
 0x1d9   :  { %213 = shalt.err (!%p210_p4)
}
 0x1da   :  { %s214_s10 = scalar_lea.hbm %s305_s5, 256 }
 0x1db   :  { %p215_p5 = scmp.ne.s32.totalorder %s305_s5, %s214_s10  ;;  %p218_p6 = scmp.lt.u32.totalorder %s214_s10, %s305_s5 }
 0x1dd   :  { %p220_p7 = pnand %p218_p6, %p215_p5 }
 0x1df   :  { %223 = shalt.err (!%p220_p7)
}
 0x1e0   :  { %s233_s15 = smov 128   ;;  %s234_s16 = smov 8  }
 0x1e1   :  { %174 = dma.vmem_to_hbm [thread:$0]  %s169_s4, 256, %s305_s5, [#allocation3], %s233_s15, %s233_s15, %s234_s16  }
 0x1e2   :  { %224 = dma.done.wait [#allocation3], 256  }
 0x1e3   :  { %225 = vsyncadd [#allocation3], 4294967040 }
 0x1e4   :  { %178 = vsyncpa [#allocation3], 1 }

</bundles_post_ra>
